<compile_context>
chip_gen: v7x
topology: tpu7x:2x2x1
jax: 0.10.0
libtpu: 0.0.40
codegen_flags: <defaults>
</compile_context>

<pallas_src>
import jax
import jax.numpy as jnp
from jax.experimental import pallas as pl
from jax.experimental.pallas import tpu as pltpu


def _attn_kernel(wq_ref, k_ref, ua_wt_ref, va_ref, ctx_ref, w_ref):
    # wq_ref:    (TB, D)     = Wa(query) + wa_b + ua_b   (hoisted to wrapper)
    # k_ref:     (TB, S, D)  keys for TB batch elements
    # ua_wt_ref: (D, D)      Ua^T
    # va_ref:    (1, D)      Va as a row (bias dropped: softmax shift-invariant)
    tb, s, d = k_ref.shape

    # Ua(keys) as one dense (TB*S, D) @ (D, D) MXU GEMM.  The reshape is a free
    # sublane merge as long as S % 8 == 0 (true for the shapes exercised here).
    uk = jnp.dot(k_ref[...].reshape(tb * s, d), ua_wt_ref[...],
                 preferred_element_type=jnp.float32).reshape(tb, s, d)

    # tanh(Wa(q) + wa_b + Ua(k) + ua_b); biases were folded into wq upstream.
    t = jnp.tanh(uk + wq_ref[...][:, None, :])              # (TB, S, D)

    # Va projection: VPU multiply + XLU lane reduction (no N=1 MXU matmul).
    scores = jnp.sum(t * va_ref[...], axis=-1)               # (TB, S)

    # Softmax over S (lane axis) -- no transpose/relayout needed.
    m = jnp.max(scores, axis=-1, keepdims=True)
    e = jnp.exp(scores - m)
    w = e * pl.reciprocal(jnp.sum(e, axis=-1, keepdims=True), approx=False)

    # context = weights @ keys as a VPU multiply + sublane reduction instead of
    # TB degenerate M=1 MXU matmuls.  Re-read k_ref here (rather than reusing
    # the variable captured before the GEMM/tanh) to keep vreg pressure low.
    ctx = jnp.sum(w[:, :, None] * k_ref[...], axis=1)         # (TB, D)

    w_ref[...] = w.astype(w_ref.dtype)
    ctx_ref[...] = ctx.astype(ctx_ref.dtype)


def _vmem_limit_bytes():
    """Generation-aware scoped-VMEM budget (explicit so large tiles fit)."""
    cap = 64 << 20                      # conservative default (v7x physical VMEM)
    try:
        info = pltpu.get_tpu_info()
        cap = int(getattr(info, "vmem_capacity_bytes", cap)) or cap
    except Exception:
        pass
    # Leave headroom below physical capacity; well above the 16 MiB (v5e) /
    # 32 MiB (v6e, v7x) scoped defaults so the bigger batch tiles actually land.
    return max(16 << 20, min(cap * 3 // 4, 96 << 20))


def _select_batch_tile(B, S, D, key_itemsize, vmem_limit):
    """Pick the batch tile TB: ~1 MiB of keys per buffer, inside the VMEM budget,
    >= 2 tiles when B is large (megacore), and sublane-rule friendly."""
    it = 4  # f32 compute / outputs
    # Per-batch-element bytes that scale with TB:
    #   double-buffered blocks (keys, wq, context, weights) +
    #   ~3 live f32 (TB, S, D) temporaries inside the body (uk, tanh, w*k).
    per_b = (2 * (S * D * key_itemsize + D * it + D * it + S * it)
             + 3 * S * D * it)
    fixed = 2 * (D * D * it + D * it)          # Ua^T and Va row (double-buffered)
    budget = int(vmem_limit * 0.6)             # headroom for compiler scratch
    tb_vmem = max(1, (budget - fixed) // per_b)
    tb_dma = max(1, (1 << 20) // max(S * D * key_itemsize, 1))  # ~1 MiB keys/buf
    tb = min(B, tb_vmem, tb_dma)
    # Keep at least two batch tiles so the "parallel" axis spans both v7x TCs.
    if B >= 16:
        tb = min(tb, B // 2)
    # Sublane rule: second-to-last block dim must be a multiple of 8 unless it
    # spans the full array.  Prefer a multiple of 8; tiny batches use one tile.
    if tb < B:
        tb8 = (tb // 8) * 8
        tb = tb8 if tb8 >= 8 else B
    return tb


def nn_attention(query, keys, wa_w, wa_b, ua_w, ua_b, va_w, va_b):
    """query: (B, 1, D), keys: (B, S, D). Weights in PyTorch Linear layout:
    wa_w/ua_w: (D, D), wa_b/ua_b: (D,), va_w: (1, D), va_b: (1,)."""
    B, _, D = query.shape
    S = keys.shape[1]

    # Hoist Wa(query) out of the kernel: one batched (B, D) @ (D, D) GEMM in
    # XLA instead of B single-row MXU pushes.  Fold both Linear biases into it.
    wq = query.reshape(B, D) @ wa_w.T + (wa_b + ua_b)        # (B, D)

    ua_wt = ua_w.T                                           # (D, D)
    va_row = va_w.reshape(1, D)                              # Va as a row
    # va_b is intentionally NOT passed: softmax is shift-invariant, so the
    # scalar Va bias cannot change either output.
    del va_b

    vmem_limit = _vmem_limit_bytes()
    tb = _select_batch_tile(B, S, D, keys.dtype.itemsize, vmem_limit)
    grid = (pl.cdiv(B, tb),)
    # No jnp.pad of keys: a non-dividing batch just uses Pallas' masked
    # boundary block (rows are independent; out-of-bounds writes are dropped).

    grid_spec = pltpu.PrefetchScalarGridSpec(
        num_scalar_prefetch=0,
        grid=grid,
        in_specs=[
            pl.BlockSpec((tb, D), lambda b: (b, 0)),          # Wa(q)+biases
            pl.BlockSpec((tb, S, D), lambda b: (b, 0, 0)),    # keys tile
            pl.BlockSpec((D, D), lambda b: (0, 0)),           # Ua^T (invariant)
            pl.BlockSpec((1, D), lambda b: (0, 0)),           # Va row (invariant)
        ],
        out_specs=[
            pl.BlockSpec((tb, D), lambda b: (b, 0)),          # context slab
            pl.BlockSpec((tb, S), lambda b: (b, 0)),          # weights slab
        ],
    )

    ctx2, w2 = pl.pallas_call(
        _attn_kernel,
        grid_spec=grid_spec,
        out_shape=(
            jax.ShapeDtypeStruct((B, D), jnp.float32),
            jax.ShapeDtypeStruct((B, S), jnp.float32),
        ),
        compiler_params=pltpu.CompilerParams(
            dimension_semantics=("parallel",),   # batch tiles across v7x TCs
            vmem_limit_bytes=int(vmem_limit),
        ),
    )(wq, keys, ua_wt, va_row)

    context = ctx2.reshape(B, 1, D)
    weights = w2.reshape(B, 1, S)
    return context, weights


def _reference(query, keys, wa_w, wa_b, ua_w, ua_b, va_w, va_b):
    wq = query @ wa_w.T + wa_b                      # (B, 1, D)
    uk = keys @ ua_w.T + ua_b                       # (B, S, D)
    s = jnp.tanh(wq + uk) @ va_w.T + va_b           # (B, S, 1)
    s = jnp.transpose(s, (0, 2, 1))                 # (B, 1, S)
    w = jax.nn.softmax(s, axis=-1)
    ctx = jnp.einsum("bos,bsd->bod", w, keys)
    return ctx, w


if __name__ == "__main__":
    key = jax.random.PRNGKey(0)
    # Cases: even batch split (>=2 grid steps, exercises megacore sharding),
    # ragged tiny batch (single full-batch tile path), and a larger batch/S
    # that exercises the bigger auto-selected tile.
    for (B, S, D) in [(16, 8, 32), (3, 8, 32), (64, 16, 32)]:
        key, k_q, k_k, k_w1, k_b1, k_w2, k_b2, k_w3, k_b3 = jax.random.split(key, 9)

        query = jax.random.normal(k_q, (B, 1, D), dtype=jnp.float32)
        keys = jax.random.normal(k_k, (B, S, D), dtype=jnp.float32)

        bound = 1.0 / (D ** 0.5)
        wa_w = jax.random.uniform(k_w1, (D, D), jnp.float32, -bound, bound)
        wa_b = jax.random.uniform(k_b1, (D,), jnp.float32, -bound, bound)
        ua_w = jax.random.uniform(k_w2, (D, D), jnp.float32, -bound, bound)
        ua_b = jax.random.uniform(k_b2, (D,), jnp.float32, -bound, bound)
        va_w = jax.random.uniform(k_w3, (1, D), jnp.float32, -bound, bound)
        va_b = jax.random.uniform(k_b3, (1,), jnp.float32, -bound, bound)

        ctx, w = nn_attention(query, keys, wa_w, wa_b, ua_w, ua_b, va_w, va_b)
        jax.block_until_ready((ctx, w))

        ctx_ref, w_ref = _reference(query, keys, wa_w, wa_b, ua_w, ua_b, va_w, va_b)
        assert ctx.shape == (B, 1, D) and w.shape == (B, 1, S)
        assert jnp.allclose(ctx, ctx_ref, atol=1e-5, rtol=1e-5), (B, S, D)
        assert jnp.allclose(w, w_ref, atol=1e-5, rtol=1e-5), (B, S, D)

    print("KERNEL_OK")
</pallas_src>

<mosaic_0001>
module attributes {stable_mosaic.version = 11 : i64} {
  func.func @_attn_kernel(%arg0: i32, %arg1: memref<8x32xf32, #tpu.memory_space<vmem>>, %arg2: memref<8x8x32xf32, #tpu.memory_space<vmem>>, %arg3: memref<32x32xf32, #tpu.memory_space<vmem>>, %arg4: memref<1x32xf32, #tpu.memory_space<vmem>>, %arg5: memref<8x32xf32, #tpu.memory_space<vmem>>, %arg6: memref<8x8xf32, #tpu.memory_space<vmem>>) attributes {dimension_semantics = [#tpu.dimension_semantics<parallel>], iteration_bounds = array<i64: 2>, scalar_prefetch = 0 : i64, scratch_operands = 0 : i64, tpu.core_type = #tpu.core_type<tc>, window_params = [{transform_indices = @transform_0, window_bounds = array<i64: 8, 32>}, {transform_indices = @transform_1, window_bounds = array<i64: 8, 8, 32>}, {pipeline_mode = #tpu.pipeline_mode<synchronous>, transform_indices = @transform_2, window_bounds = array<i64: 32, 32>}, {pipeline_mode = #tpu.pipeline_mode<synchronous>, transform_indices = @transform_3, window_bounds = array<i64: 1, 32>}, {transform_indices = @transform_4, window_bounds = array<i64: 8, 32>}, {transform_indices = @transform_5, window_bounds = array<i64: 8, 8>}]} {
    %c0 = arith.constant 0 : index
    %c0_0 = arith.constant 0 : index
    %c0_1 = arith.constant 0 : index
    %0 = vector.load %arg2[%c0, %c0_0, %c0_1] : memref<8x8x32xf32, #tpu.memory_space<vmem>>, vector<8x8x32xf32>
    %1 = vector.shape_cast %0 : vector<8x8x32xf32> to vector<64x32xf32>
    %c0_2 = arith.constant 0 : index
    %c0_3 = arith.constant 0 : index
    %2 = vector.load %arg3[%c0_2, %c0_3] : memref<32x32xf32, #tpu.memory_space<vmem>>, vector<32x32xf32>
    %cst = arith.constant dense<0.000000e+00> : vector<64x32xf32>
    %3 = tpu.matmul %1, %2, %cst {dimension_numbers = #tpu.dot_dimension_numbers<[1], [0], [0], [1], [0, 0, 1, 1], [], []>} : vector<64x32xf32>, vector<32x32xf32>, vector<64x32xf32> -> vector<64x32xf32>
    %4 = vector.shape_cast %3 : vector<64x32xf32> to vector<8x8x32xf32>
    %c0_4 = arith.constant 0 : index
    %c0_5 = arith.constant 0 : index
    %5 = vector.load %arg1[%c0_4, %c0_5] : memref<8x32xf32, #tpu.memory_space<vmem>>, vector<8x32xf32>
    %6 = vector.shape_cast %5 : vector<8x32xf32> to vector<8x1x32xf32>
    %7 = vector.broadcast %6 : vector<8x1x32xf32> to vector<8x8x32xf32>
    %8 = arith.addf %4, %7 : vector<8x8x32xf32>
    %9 = math.tanh %8 : vector<8x8x32xf32>
    %c0_6 = arith.constant 0 : index
    %c0_7 = arith.constant 0 : index
    %10 = vector.load %arg4[%c0_6, %c0_7] : memref<1x32xf32, #tpu.memory_space<vmem>>, vector<1x32xf32>
    %11 = vector.shape_cast %10 : vector<1x32xf32> to vector<1x1x32xf32>
    %12 = vector.broadcast %11 : vector<1x1x32xf32> to vector<8x8x32xf32>
    %13 = arith.mulf %9, %12 : vector<8x8x32xf32>
    %cst_8 = arith.constant dense<0.000000e+00> : vector<8x8xf32>
    %14 = vector.multi_reduction <add>, %13, %cst_8 [2] : vector<8x8x32xf32> to vector<8x8xf32>
    %cst_9 = arith.constant dense<0xFF800000> : vector<8xf32>
    %15 = vector.multi_reduction <maximumf>, %14, %cst_9 [1] : vector<8x8xf32> to vector<8xf32>
    %16 = vector.shape_cast %15 : vector<8xf32> to vector<8x1xf32>
    %17 = vector.broadcast %16 : vector<8x1xf32> to vector<8x8xf32>
    %18 = arith.subf %14, %17 : vector<8x8xf32>
    %19 = math.exp %18 : vector<8x8xf32>
    %cst_10 = arith.constant dense<0.000000e+00> : vector<8xf32>
    %20 = vector.multi_reduction <add>, %19, %cst_10 [1] : vector<8x8xf32> to vector<8xf32>
    %21 = vector.shape_cast %20 : vector<8xf32> to vector<8x1xf32>
    %22 = tpu.reciprocal %21 : vector<8x1xf32> -> vector<8x1xf32>
    %23 = vector.broadcast %22 : vector<8x1xf32> to vector<8x8xf32>
    %24 = arith.mulf %19, %23 : vector<8x8xf32>
    %25 = vector.shape_cast %24 : vector<8x8xf32> to vector<8x8x1xf32>
    %c0_11 = arith.constant 0 : index
    %c0_12 = arith.constant 0 : index
    %c0_13 = arith.constant 0 : index
    %26 = vector.load %arg2[%c0_11, %c0_12, %c0_13] : memref<8x8x32xf32, #tpu.memory_space<vmem>>, vector<8x8x32xf32>
    %27 = vector.broadcast %25 : vector<8x8x1xf32> to vector<8x8x32xf32>
    %28 = arith.mulf %27, %26 : vector<8x8x32xf32>
    %cst_14 = arith.constant dense<0.000000e+00> : vector<8x32xf32>
    %29 = vector.multi_reduction <add>, %28, %cst_14 [1] : vector<8x8x32xf32> to vector<8x32xf32>
    %c0_15 = arith.constant 0 : index
    %c0_16 = arith.constant 0 : index
    %30 = vector.load %arg6[%c0_15, %c0_16] : memref<8x8xf32, #tpu.memory_space<vmem>>, vector<8x8xf32>
    tpu.vector_store %arg6[%c0_15, %c0_16], %24 {strides = array<i32>} : memref<8x8xf32, #tpu.memory_space<vmem>>, vector<8x8xf32>,
    %c0_17 = arith.constant 0 : index
    %c0_18 = arith.constant 0 : index
    %31 = vector.load %arg5[%c0_17, %c0_18] : memref<8x32xf32, #tpu.memory_space<vmem>>, vector<8x32xf32>
    tpu.vector_store %arg5[%c0_17, %c0_18], %29 {strides = array<i32>} : memref<8x32xf32, #tpu.memory_space<vmem>>, vector<8x32xf32>,
    return
  }
  func.func @transform_0(%arg0: i32) -> (i32, i32) {
    %c0_i32 = arith.constant 0 : i32
    %c0_i32_0 = arith.constant 0 : i32
    return %arg0, %c0_i32 : i32, i32
  }
  func.func @transform_1(%arg0: i32) -> (i32, i32, i32) {
    %c0_i32 = arith.constant 0 : i32
    %c0_i32_0 = arith.constant 0 : i32
    %c0_i32_1 = arith.constant 0 : i32
    return %arg0, %c0_i32, %c0_i32_0 : i32, i32, i32
  }
  func.func @transform_2(%arg0: i32) -> (i32, i32) {
    %c0_i32 = arith.constant 0 : i32
    %c0_i32_0 = arith.constant 0 : i32
    %c0_i32_1 = arith.constant 0 : i32
    return %c0_i32, %c0_i32_0 : i32, i32
  }
  func.func @transform_3(%arg0: i32) -> (i32, i32) {
    %c0_i32 = arith.constant 0 : i32
    %c0_i32_0 = arith.constant 0 : i32
    %c0_i32_1 = arith.constant 0 : i32
    return %c0_i32, %c0_i32_0 : i32, i32
  }
  func.func @transform_4(%arg0: i32) -> (i32, i32) {
    %c0_i32 = arith.constant 0 : i32
    %c0_i32_0 = arith.constant 0 : i32
    return %arg0, %c0_i32 : i32, i32
  }
  func.func @transform_5(%arg0: i32) -> (i32, i32) {
    %c0_i32 = arith.constant 0 : i32
    %c0_i32_0 = arith.constant 0 : i32
    return %arg0, %c0_i32 : i32, i32
  }
}

</mosaic_0001>

<bundles_post_ra>
// kernel: tpu_custom_call.1
= control target key start
LH: loop header
LB: loop body
LE: loop exit
PB: predicated region body
PF: predicated region fallthrough
CT: control target
= control target key end

     0   :  { %s1978_s0 = inlined_call_operand.hbm [shape: f32[16,32], index: 0, kind: input, shape index: {}]   ;;  %s1979_s1 = inlined_call_operand.hbm [shape: f32[16,8,32], index: 1, kind: input, shape index: {}]   ;;  %s1980_s2 = inlined_call_operand.hbm [shape: f32[32,32], index: 2, kind: input, shape index: {}]   ;;  %s1981_s3 = inlined_call_operand.vmem [shape: f32[1,32], index: 3, kind: input, shape index: {}]   ;;  %s1982_s4 = inlined_call_operand.hbm [shape: f32[16,32], index: 4, kind: output, shape index: {0}]   ;;  %s1983_s5 = inlined_call_operand.vmem [shape: f32[16,8], index: 5, kind: output, shape index: {1}]  }
   0x1   :  { %1989 = sst [smem:[#allocation13_spill]] %s1978_s0 }
   0x2   :  { %11 = vsyncpa [#allocation3], 0 }
   0x3   :  { %13 = vsyncpa [#allocation3 + $0x1], 0 }
   0x4   :  { %14 = vsyncpa [#allocation6], 0 }
   0x5   :  { %16 = vsyncpa [#allocation6 + $0x1], 0 }
   0x6   :  { %17 = vsyncpa [#allocation4], 0 }
   0x7   :  { %19 = vsyncpa [#allocation4 + $0x1], 0  ;;  %s1532_s18 = smov 0   ;;  %s1534_s19 = smov 0  }
   0x8   :  { %s1536_s20 = smov 0   ;;  %s1538_s21 = smov 0  }
   0x9 LB: > { %s1553_s22 = sadd.s32 4294967295, %s1492_s21   ;;  %s1154_s23 = sadd.s32 4294967294, %s1492_s21   ;;  %s1492_s21 = sphi %s1538_s21, %s2009_s21   ;;  %s1488_s20 = sphi %s1536_s20, %s2008_s20   ;;  %s1484_s19 = sphi %s1534_s19, %s2007_s19   ;;  %s1480_s18 = sphi %s1532_s18, %s2006_s18  }
   0xa   : > { %p45_p0 = scmp.ne.s32.totalorder %s1484_s19, %s1480_s18  ;;  %p1984_p1 = scmp.eq.s32.totalorder %s1553_s22, 0 }
   0xb   : > { %p143_p3 = scmp.eq.s32.totalorder %s1154_s23, 1  ;;  %p1155_p5 = scmp.ge.s32.totalorder %s1492_s21, 1 }
   0xc   : > { %p1562_p4 = por %p1984_p1, %p45_p0  ;;  %p176_p7 = scmp.lt.s32.totalorder %s1492_s21, 3 }
   0xd   : > { %p1567_p6 = por %p143_p3, %p45_p0  ;;  %s1494_s27 = smov [#allocation7]  }
   0xe   : > { %s1990_s24 = scalar_select %p1562_p4, 1, 0 }
   0xf   : > { %s1991_s25 = scalar_select %p1567_p6, 1, 0 }
  0x10   : > { %p1572_p8 = pnand %p1155_p5, %p176_p7  ;;  %s188_s28 = sshll.u32 %s1494_s27, 4  ;;  %s1576_s28 = int_to_ptr.vmem [resolvable:$true] %s188_s28 }
  0x11   : > { %s1588_s30 = sadd.s32 1, %s1492_s21   ;;  %s32_s6 = sadd.s32 1, %s1488_s20 }
  0x12   : > { %s1992_s26 = scalar_select %p1572_p8, 1, 0 }
  0x13   : > { %p1237_p9 = pneg %p1572_p8  ;;  %s29_s7 = ssub.s32 %s1492_s21, %s1588_s30 }
  0x14   : > { %s1330_s10 = scalar_lea.hbm %s1980_s2, 512 }
  0x15   : > { %p1583_p11 = pnand %p1237_p9, %p1984_p1  ;;  %p1331_p12 = scmp.ne.s32.totalorder %s1980_s2, %s1330_s10 }
  0x16   : > { %p1337_p5 = scmp.lt.u32.totalorder %s1330_s10, %s1980_s2 }
  0x17   : > { %p1332_p13 = pneg %p1583_p11 }
  0x19   : > { %p1333_p0 = pnand %p1332_p13, %p1331_p12 }
  0x1b   : > { %p1334_p3 = pneg %p1333_p0 }
  0x1d   : > { %p1339_p7 = pnand %p1337_p5, %p1334_p3 }
  0x1f   : > { %1342 = shalt.err (!%p1339_p7)
}
  0x20   : > { %s1343_s15 = scalar_lea.vmem %s1576_s28, 512  ;;  %p1351_p2 = scmp.lt.s32.totalorder %s1576_s28, %s1576_s28 }
  0x21   : > { %p1344_p9 = scmp.ne.s32.totalorder %s1576_s28, %s1343_s15  ;;  %p1352_p6 = scmp.lt.s32.totalorder %s1343_s15, %s1343_s15 }
  0x23   : > { %p1346_p10 = pnand %p1344_p9, %p1332_p13  ;;  %p1353_p4 = por %p1352_p6, %p1351_p2 }
  0x25   : > { %p1347_p1 = pneg %p1346_p10 }
  0x27   : > { %p1354_p8 = pnand %p1353_p4, %p1347_p1 }
  0x29   : > { %1357 = shalt.err (!%p1354_p8)
}
  0x2a   : > { %s1987_s16 = smov 128   ;;  %s1988_s17 = smov 8  }
  0x2b   : > { %1240 = dma.hbm_to_vmem [thread:$0]  (!%p1583_p11), %s1980_s2, 512, %s1576_s28, [#allocation6], %s1987_s16, %s1987_s16, %s1988_s17  }
  0x2c   : > { %p30_p1 = scmp.eq.s32.totalorder %s29_s7, 0  ;;  %p39_p2 = scmp.ne.s32.totalorder %s1488_s20, %s1484_s19 }
  0x2d   : > { %p40_p4 = scmp.eq.s32.totalorder %s1492_s21, 0  ;;  %p1253_p6 = scmp.lt.s32.totalorder %s1492_s21, 2 }
  0x2e   : > { %s1622_s8 = scalar_select %p30_p1, %s1488_s20, %s32_s6  }
  0x2f   : > { %p41_p8 = por %p40_p4, %p39_p2  ;;  %p1994_p10 = scmp.eq.s32.totalorder %s1553_s22, 1 }
  0x30   : > { %s1631_s29 = sand.u32 1, %s1488_s20   ;;  %s1159_s10 = sshll.u32 %s1492_s21, 7 }
  0x31   : > { %p1626_p12 = por %p1994_p10, %p39_p2  ;;  %s1158_s11 = sshll.u32 %s1631_s29, 3 }
  0x32   : > { %s1996_s0 = sld [smem:[#allocation13_spill]]  ;;  %s209_s6 = scalar_lea.vmem [#allocation2], %s1158_s11 }
  0x33   : > { %s216_s13 = sshll.u32 %s209_s6, 4  ;;  %p1640_p11 = pnand %p1253_p6, %p41_p8  ;;  %s1644_s13 = int_to_ptr.vmem [resolvable:$true] %s216_s13 }
  0x34   : > { %s1160_s15 = sshll.u32 %s1631_s29, 6  ;;  %s206_s23 = scalar_lea.sflag [#allocation3], %s1631_s29 }
  0x35   : > { %p1360_p0 = pneg %p1640_p11 }
  0x38   : > { %s1638_s12 = scalar_lea.hbm %s1996_s0, %s1159_s10  ;;  %s1363_s28 = scalar_lea.hbm %s1996_s0, 256 }
  0x39   : > { %s1358_s27 = scalar_lea.hbm %s1638_s12, 128  ;;  %p1364_p7 = scmp.lt.u32.totalorder %s1638_s12, %s1996_s0 }
  0x3a   : > { %p1359_p13 = scmp.ne.s32.totalorder %s1638_s12, %s1358_s27  ;;  %p1365_p9 = scmp.lt.u32.totalorder %s1363_s28, %s1358_s27 }
  0x3b   : > { %p1367_p2 = scmp.lt.u32.totalorder %s1358_s27, %s1638_s12 }
  0x3c   : > { %p1361_p3 = pnand %p1360_p0, %p1359_p13  ;;  %p1366_p1 = por %p1365_p9, %p1364_p7 }
  0x3e   : > { %p1362_p5 = pneg %p1361_p3  ;;  %p1368_p4 = por %p1367_p2, %p1366_p1 }
  0x40   : > { %p1369_p6 = pnand %p1368_p4, %p1362_p5 }
  0x42   : > { %1372 = shalt.err (!%p1369_p6)
}
  0x43   : > { %s1373_s16 = scalar_lea.vmem %s1644_s13, 128  ;;  %s1497_s10 = smov [#allocation2]  }
  0x44   : > { %p1374_p8 = scmp.ne.s32.totalorder %s1644_s13, %s1373_s16  ;;  %s1378_s11 = sshll.u32 %s1497_s10, 4  ;;  %s1379_s11 = int_to_ptr.vmem [resolvable:$false] %s1378_s11 }
  0x45   : > { %s1380_s7 = scalar_lea.vmem %s1379_s11, 256  ;;  %p1381_p3 = scmp.lt.s32.totalorder %s1644_s13, %s1379_s11 }
  0x46   : > { %p1376_p10 = pnand %p1374_p8, %p1360_p0  ;;  %p1382_p7 = scmp.lt.s32.totalorder %s1380_s7, %s1373_s16 }
  0x48   : > { %p1377_p13 = pneg %p1376_p10  ;;  %p1383_p9 = por %p1382_p7, %p1381_p3 }
  0x4a   : > { %p1384_p1 = pnand %p1383_p9, %p1377_p13 }
  0x4c   : > { %1387 = shalt.err (!%p1384_p1)
}
  0x4d   : > { %1244 = dma.hbm_to_vmem [thread:$0]  (!%p1640_p11), %s1638_s12, 128, %s1644_s13, %s206_s23  }
  0x4e   : > { %s227_s27 = scalar_lea.vmem [#allocation5], %s1160_s15  ;;  %s223_s6 = sand.u32 1, %s1492_s21  }
  0x4f   : > { %s234_s28 = sshll.u32 %s227_s27, 4  ;;  %s1182_s10 = sshll.u32 %s1492_s21, 10  ;;  %s1676_s28 = int_to_ptr.vmem [resolvable:$true] %s234_s28 }
  0x50   : > { %s1682_s7 = scalar_lea.hbm %s1979_s1, %s1182_s10  ;;  %s1684_s17 = scalar_lea.sflag [#allocation6], %s223_s6 }
  0x51   : > { %s1388_s0 = scalar_lea.hbm %s1682_s7, 1024  ;;  %s1393_s13 = scalar_lea.hbm %s1979_s1, 2048 }
  0x52   : > { %p1389_p5 = scmp.ne.s32.totalorder %s1682_s7, %s1388_s0  ;;  %p1394_p6 = scmp.lt.u32.totalorder %s1682_s7, %s1979_s1 }
  0x53   : > { %p1395_p8 = scmp.lt.u32.totalorder %s1393_s13, %s1388_s0  ;;  %p1397_p13 = scmp.lt.u32.totalorder %s1388_s0, %s1682_s7 }
  0x54   : > { %p1391_p2 = pnand %p1389_p5, %p1360_p0 }
  0x55   : > { %p1396_p10 = por %p1395_p8, %p1394_p6 }
  0x56   : > { %p1392_p4 = pneg %p1391_p2 }
  0x57   : > { %p1398_p3 = por %p1397_p13, %p1396_p10 }
  0x59   : > { %p1399_p7 = pnand %p1398_p3, %p1392_p4 }
  0x5b   : > { %1402 = shalt.err (!%p1399_p7)
}
  0x5c   : > { %s1403_s27 = scalar_lea.vmem %s1676_s28, 1024  ;;  %s1498_s6 = smov [#allocation5]  }
  0x5d   : > { %p1404_p9 = scmp.ne.s32.totalorder %s1676_s28, %s1403_s27  ;;  %s1408_s10 = sshll.u32 %s1498_s6, 4  ;;  %s1409_s10 = int_to_ptr.vmem [resolvable:$false] %s1408_s10 }
  0x5e   : > { %s1410_s16 = scalar_lea.vmem %s1409_s10, 2048  ;;  %p1411_p2 = scmp.lt.s32.totalorder %s1676_s28, %s1409_s10 }
  0x5f   : > { %p1406_p1 = pnand %p1404_p9, %p1360_p0  ;;  %p1412_p6 = scmp.lt.s32.totalorder %s1410_s16, %s1403_s27 }
  0x61   : > { %p1407_p5 = pneg %p1406_p1  ;;  %p1413_p8 = por %p1412_p6, %p1411_p2 }
  0x63   : > { %p1414_p10 = pnand %p1413_p8, %p1407_p5 }
  0x65   : > { %1417 = shalt.err (!%p1414_p10)
}
  0x66   : > { %s1998_s0 = smov 8   ;;  %s1999_s11 = smov 128  }
  0x67   : > { %1247 = dma.hbm_to_vmem [thread:$0]  (!%p1640_p11), %s1682_s7, 1024, %s1676_s28, %s1684_s17, %s1999_s11, %s1999_s11, %s1998_s0  }
  0x68   : > { %p2000_p0 = scmp.ne.s32.totalorder %s1992_s26, 0 }
  0x69   : > { %s1716_s29 = sand.u32 (!%p2000_p0), 1, %s1484_s19   ;;  %p2001_p4 = scmp.ne.s32.totalorder (!%p2000_p0), %s1990_s24, 0 }
  0x6a   : > { %246 = sbr.rel (%p2000_p0) target bundleno = 1179 (0x49b), region = 36  ;;  %s1164_s12 = sshll.u32 (!%p2000_p0), %s1716_s29, 3 }
  0x6b   : > { %s249_s13 = scalar_lea.sflag (!%p2000_p0), [#allocation3], %s1716_s29  ;;  %s1722_s14 = scalar_lea.vmem (!%p2000_p0), [#allocation2], %s1164_s12 }
  0x71   : > { %1463 = dma.done.wait (%p2001_p4), %s249_s13, 128  }
  0x72   : > { %1465 = vsyncadd (%p2001_p4), %s249_s13, 4294967168  ;;  %s257_s26 = sand.u32 1, %s1553_s22   ;;  %s1165_s17 = sshll.u32 %s1716_s29, 6 }
  0x73   : > { %s258_s28 = scalar_lea.sflag [#allocation6], %s257_s26  ;;  %s1730_s7 = scalar_lea.vmem [#allocation5], %s1165_s17 }
  0x74   : > { %1467 = dma.done.wait (%p2001_p4), %s258_s28, 1024  }
  0x75   : > { %1469 = vsyncadd (%p2001_p4), %s258_s28, 4294966272  ;;  %p2002_p11 = scmp.eq.s32.totalorder %s1553_s22, 0 }
  0x77   : > { %1471 = dma.done.wait (%p2002_p11), [#allocation6], 512   ;;  %p2003_p13 = pmov %p2002_p11 }
  0x78   : > { %vm318_vm0 = vcmask 261120   ;;  %v314_v0 = vld [vmem:[#allocation7] sm:$0xff]  ;;  %v315_v1 = vld [vmem:[#allocation7 + $0x8] sm:$0xff]  ;;  %v316_v2 = vld [vmem:[#allocation7 + $0x10] sm:$0xff]  ;;  %v1499_v14 = vmov 1966171168   ;;  %v454_v16 = vlaneseq }
  0x79   : > { %1473 = vsyncadd (%p2003_p13), [#allocation6], 4294966784  ;;  %v1215_v3 = vpack.c.bf16 %v315_v1, %v314_v0  ;;  %v317_v4 = vld [vmem:[#allocation7 + $0x18] sm:$0xff]  ;;  %v1741_v5 = vld [vmem:[%s1730_s7] sm:$0xff]  ;;  %v452_v15 = vunpack.c.l.s4 %v1499_v14  ;;  %vm636_vm1 = vcmask 1041409   ;;  %vm638_vm2 = vcmask 1042434  }
  0x7a   : > { %v1219_v6 = vpack.c.bf16 %v317_v4, %v316_v2  ;;  %1203 = vmatprep.mubr.msk.f32.mxu0 %vm318_vm0, %v1741_v5  ;;  %v1746_v7 = vld [vmem:[%s1730_s7 + $0x20] sm:$0xff]  ;;  %v1751_v8 = vld [vmem:[%s1730_s7 + $0x8] sm:$0xff]  ;;  %v1757_v10 = vld [vmem:[%s1730_s7 + $0x10] sm:$0xff]  ;;  %v1781_v18 = vshrl.u32 %v454_v16, 7  ;;  %vm640_vm3 = vcmask 1043459   ;;  %vm642_vm4 = vcmask 1044484  }
  0x7b   : > { %1216 = vmatprep.subr.bf16.mxu0 %v1215_v3  ;;  %1223 = vmatprep.subr.bf16.mxu1 %v1215_v3  ;;  %v1754_v9 = vld [vmem:[%s1730_s7 + $0x28] sm:$0xff]  ;;  %v1760_v11 = vld [vmem:[%s1730_s7 + $0x30] sm:$0xff]  ;;  %v1769_v12 = vld [vmem:[%s1730_s7 + $0x18] sm:$0xff]  ;;  %v453_v17 = vunpack.c.0.s8 %v452_v15  ;;  %vm644_vm5 = vcmask 1045509   ;;  %vm646_vm6 = vcmask 1046534   ;;  %vm648_vm7 = vcmask 1047559  }
  0x7c   : > { %1218 = vmatpush3.bf16.msra.mxu0 %v1215_v3  ;;  %1225 = vmatpush3.bf16.msra.mxu1 %v1215_v3  ;;  %v1774_v13 = vld [vmem:[%s1730_s7 + $0x38] sm:$0xff]  ;;  %v1786_v26 = vsub.s32 0, %v1781_v18  ;;  %v1177_v59 = vld [vmem:[%s1981_s3] ss:$0 sm:$0xff]  ;;  %vm651_vm8 = vcmask 64512   ;;  %p302_p3 = scmp.lt.s32.totalorder %s1553_s22, 1 }
  0x7d   : > { %1220 = vmatprep.subr.bf16.mxu0 %v1219_v6  ;;  %1224 = vmatprep.subr.bf16.mxu1 %v1219_v6  ;;  %v456_v19 = vsub.s32 %v453_v17, %v1781_v18  ;;  %v448_v20 = vld [vmem:[%s1722_s14] sm:$0xff]  ;;  %s1179_s0 = sshll.u32 %s1553_s22, 7  ;;  %s294_s11 = scalar_lea.vmem [#allocation8], %s1164_s12 }
  0x7e   : > { %1209 = vmatprep.mubr.msk.f32.mxu1 %vm318_vm0, %v1746_v7  ;;  %v450_v22 = vcombine.high %v448_v20, %v448_v20  ;;  %s1896_s23 = scalar_select %p302_p3, %s1553_s22, 1 }
  0x7f   : > { %v457_v21 = vrot.slane %v448_v20, %v456_v19  ;;  %s1025_s13 = sshll.u32 %s294_s11, 4  ;;  %s1932_s17 = scalar_lea.hbm %s1982_s4, %s1179_s0  ;;  %s1934_s13 = int_to_ptr.vmem [resolvable:$true] %s1025_s13 }
  0x80   : > { %1222 = vmatpush3.bf16.msra.mxu0 %v1219_v6  ;;  %1226 = vmatpush3.bf16.msra.mxu1 %v1219_v6  ;;  %v464_v24 = vrot.slane %v450_v22, %v456_v19  ;;  %s1168_s27 = sshll.u32 %s1896_s23, 3  ;;  %s1008_s22 = scalar_lea.sflag [#allocation4], %s1716_s29 }
  0x81   : > { %v465_v23 = vcombine.high %v457_v21, %v457_v21  ;;  %v473_v27 = vrot.slane %v457_v21, %v456_v19  ;;  %s305_s16 = scalar_lea.vmem %s1983_s5, %s1168_s27  ;;  %s1418_s12 = scalar_lea.vmem %s1934_s13, 128 }
  0x82   : > { %v480_v28 = vrot.slane %v464_v24, %v456_v19  ;;  %v466_v29 = vcombine.high %v464_v24, %v464_v24  ;;  %p1419_p7 = scmp.ne.s32.totalorder %s1934_s13, %s1418_s12  ;;  %s1501_s28 = smov [#allocation8]  }
  0x83   : > { %1204 = vmatmul.mubr.msk.f32.vlgmr.msra.gmra.mrb[0].mxu0 %vm318_vm0, %v1751_v8  ;;  %1210 = vmatmul.mubr.msk.f32.vlgmr.msra.gmra.mrb[0].mxu1 %vm318_vm0, %v1754_v9  ;;  %v487_v25 = vrot.slane %v465_v23, %v456_v19  ;;  %v502_v32 = vrot.slane %v473_v27, %v1786_v26  ;;  %v495_v33 = vcombine.high %v473_v27, %v473_v27  ;;  %s1422_s7 = sshll.u32 %s1501_s28, 4  ;;  %s1423_s7 = int_to_ptr.vmem [resolvable:$false] %s1422_s7 }
  0x84   : > { %1206 = vmatprep.mubr.msk.f32.mxu0 %vm318_vm0, %v1757_v10  ;;  %1212 = vmatprep.mubr.msk.f32.mxu1 %vm318_vm0, %v1760_v11  ;;  %v518_v34 = vrot.slane %v480_v28, %v1786_v26  ;;  %v496_v35 = vcombine.high %v480_v28, %v480_v28  ;;  %v494_v36 = vrot.slane %v466_v29, %v456_v19  ;;  %p1420_p9 = pnand %p1419_p7, %p1626_p12  ;;  %s1424_s24 = scalar_lea.vmem %s1423_s7, 256 }
  0x85   : > { %v506_v30 = vrot.slane %v487_v25, %v1786_v26  ;;  %v497_v31 = vcombine.high %v487_v25, %v487_v25  ;;  %v510_v44 = vrot.slane %v495_v33, %v1786_v26  ;;  %p1425_p5 = scmp.lt.s32.totalorder %s1934_s13, %s1423_s7  ;;  %p1426_p2 = scmp.lt.s32.totalorder %s1424_s24, %s1418_s12 }
  0x86   : > { %v526_v46 = vrot.slane %v496_v35, %v1786_v26  ;;  %v522_v47 = vrot.slane %v494_v36, %v1786_v26  ;;  %v498_v48 = vcombine.high %v494_v36, %v494_v36  ;;  %p1421_p1 = pneg %p1420_p9 }
  0x87   : > { %1207 = vmatmul.mubr.msk.f32.gmra.mrb[2].mxu0 %vm318_vm0, %v1769_v12  ;;  %1213 = vmatmul.mubr.msk.f32.gmra.mrb[2].mxu1 %vm318_vm0, %v1774_v13  ;;  %v514_v41 = vrot.slane %v497_v31, %v1786_v26  ;;  %v603_v31 = vand.u32 127, %v454_v16  ;;  %p1427_p6 = por %p1426_p2, %p1425_p5 }
  0x88   : > { %v530_v57 = vrot.slane %v498_v48, %v1786_v26 }
  0x89   : > { %v1809_v33 = vsub.s32 %v603_v31, %v1781_v18  ;;  %p1428_p8 = pnand %p1427_p6, %p1421_p1 }
 0x156   : > { %v1205_v37 = vpop.f32.mrb[0].mxu0  ;;  %v1211_v38 = vpop.f32.mrb[0].mxu1 }
 0x157   : > { %v540_v39 = vadd.f32 %v1205_v37, %v506_v30  ;;  %v409_v40 = vpop.f32.mrb[1].mxu0  ;;  %v429_v42 = vpop.f32.mrb[1].mxu1  ;;  %v544_v56 = vadd.f32 %v1211_v38, %v522_v47 }
 0x158   : > { %v539_v43 = vadd.f32 %v502_v32, %v409_v40  ;;  %v543_v45 = vadd.f32 %v518_v34, %v429_v42 }
 0x159   : > { %1296 = vtanh.f32 %v540_v39 }
 0x15a   : > { %1298 = vtanh.f32 %v539_v43  ;;  %v1208_v49 = vpop.f32.mrb[2].mxu0  ;;  %v1214_v50 = vpop.f32.mrb[2].mxu1 }
 0x15b   : > { %v542_v51 = vadd.f32 %v1208_v49, %v514_v41  ;;  %v419_v52 = vpop.f32.mrb[3].mxu0  ;;  %v439_v53 = vpop.f32.mrb[3].mxu1  ;;  %1300 = vtanh.f32 %v543_v45  ;;  %v546_v58 = vadd.f32 %v1214_v50, %v530_v57  ;;  %v662_v57 = vsub.s32 1, %v1781_v18 }
 0x15c   : > { %v541_v54 = vadd.f32 %v510_v44, %v419_v52  ;;  %v545_v55 = vadd.f32 %v526_v46, %v439_v53 }
 0x15d   : > { %1302 = vtanh.f32 %v542_v51 }
 0x15e   : > { %1304 = vtanh.f32 %v541_v54 }
 0x15f   : > { %1306 = vtanh.f32 %v545_v55 }
 0x160   : > { %1308 = vtanh.f32 %v544_v56  ;;  %v1500_v56 = vmov 0  }
 0x161   : > { %1310 = vtanh.f32 %v546_v58  ;;  %1294 = vset.pattern.permute.xlu0 %v1500_v56  ;;  %1293 = vset.pattern.permute.xlu1 %v1500_v56  ;;  %v666_v58 = vsub.s32 2, %v1781_v18 }
 0x163   : > { %v1297_v60 = vpop.eup %1296 }
 0x164   : > { %v1299_v61 = vpop.eup %1298  ;;  %v563_v62 = vmul.f32 %v1297_v60, %v1177_v59 }
 0x165   : > { %v1301_v63 = vpop.eup %1300  ;;  %v562_v1 = vmul.f32 %v1299_v61, %v1177_v59 }
 0x166   : > { %v573_v0 = vsel %vm318_vm0, %v563_v62, 0.0  ;;  %v566_v6 = vmul.f32 %v1301_v63, %v1177_v59 }
 0x167   : > { %v1303_v2 = vpop.eup %1302  ;;  %574 = vadd.xlane.f32.xlu0 %v573_v0  ;;  %v570_v15 = vsel %vm318_vm0, %v562_v1, 0.0  ;;  %v674_v0 = vsub.s32 4, %v1781_v18 }
 0x168   : > { %v1305_v3 = vpop.eup %1304  ;;  %v565_v4 = vmul.f32 %v1303_v2, %v1177_v59  ;;  %v582_v21 = vsel %vm318_vm0, %v566_v6, 0.0 }
 0x169   : > { %v1307_v14 = vpop.eup %1306  ;;  %v564_v19 = vmul.f32 %v1305_v3, %v1177_v59 }
 0x16a   : > { %v579_v17 = vsel %vm318_vm0, %v565_v4, 0.0  ;;  %v1309_v20 = vpop.eup %1308  ;;  %v568_v22 = vmul.f32 %v1307_v14, %v1177_v59 }
 0x16b   : > { %571 = vadd.xlane.f32.xlu0 %v570_v15  ;;  %580 = vadd.xlane.f32.xlu1 %v579_v17  ;;  %v576_v23 = vsel %vm318_vm0, %v564_v19, 0.0  ;;  %v567_v24 = vmul.f32 %v1309_v20, %v1177_v59  ;;  %v1311_v25 = vpop.eup %1310  ;;  %v678_v15 = vsub.s32 5, %v1781_v18 }
 0x16c   : > { %v588_v27 = vsel %vm318_vm0, %v568_v22, 0.0  ;;  %v569_v29 = vmul.f32 %v1311_v25, %v1177_v59  ;;  %v670_v59 = vsub.s32 3, %v1781_v18  ;;  %v686_v25 = vsub.s32 7, %v1781_v18 }
 0x16d   : > { %v585_v28 = vsel %vm318_vm0, %v567_v24, 0.0 }
 0x16e   : > { %v591_v30 = vsel %vm318_vm0, %v569_v29, 0.0 }
 0x16f   : > { %577 = vadd.xlane.f32.xlu1 %v576_v23  ;;  %583 = vadd.xlane.f32.xlu0 %v582_v21  ;;  %v682_v21 = vsub.s32 6, %v1781_v18 }
 0x173   : > { %586 = vadd.xlane.f32.xlu1 %v585_v28  ;;  %589 = vadd.xlane.f32.xlu0 %v588_v27 }
 0x177   : > { %592 = vadd.xlane.f32.xlu1 %v591_v30 }
 0x1f4   : > { %v575_v32 = vpop.xlane.xlu0 %574 }
 0x1f5   : > { %v611_v37 = vrot.slane %v575_v32, %v1809_v33 }
 0x1f8   : > { %v572_v34 = vpop.xlane.xlu0 %571  ;;  %v581_v35 = vpop.xlane.xlu1 %580 }
 0x1f9   : > { %v607_v36 = vrot.slane %v572_v34, %v1809_v33  ;;  %v619_v42 = vrot.slane %v581_v35, %v1809_v33 }
 0x1fb   : > { %v637_v16 = vsel %vm636_vm1, %v611_v37, %v607_v36 }
 0x1fc   : > { %v578_v38 = vpop.xlane.xlu1 %577  ;;  %v584_v39 = vpop.xlane.xlu0 %583 }
 0x1fd   : > { %v615_v40 = vrot.slane %v578_v38, %v1809_v33  ;;  %v623_v41 = vrot.slane %v584_v39, %v1809_v33 }
 0x1ff   : > { %v639_v43 = vsel %vm638_vm2, %v615_v40, %v637_v16 }
 0x200   : > { %v641_v44 = vsel %vm640_vm3, %v619_v42, %v639_v43  ;;  %v587_v45 = vpop.xlane.xlu1 %586  ;;  %v590_v46 = vpop.xlane.xlu0 %589 }
 0x201   : > { %v643_v47 = vsel %vm642_vm4, %v623_v41, %v641_v44  ;;  %v627_v48 = vrot.slane %v587_v45, %v1809_v33  ;;  %v631_v49 = vrot.slane %v590_v46, %v1809_v33 }
 0x203   : > { %v645_v50 = vsel %vm644_vm5, %v627_v48, %v643_v47 }
 0x204   : > { %v593_v51 = vpop.xlane.xlu1 %592  ;;  %v647_v53 = vsel %vm646_vm6, %v631_v49, %v645_v50 }
 0x205   : > { %v635_v52 = vrot.slane %v593_v51, %v1809_v33 }
 0x207   : > { %v649_v54 = vsel %vm648_vm7, %v635_v52, %v647_v53 }
 0x208   : > { %v652_v55 = vsel %vm651_vm8, %v649_v54, -inf }
 0x209   : > { %653 = vmax.xlane.f32.xlu0 %v652_v55 }
 0x296   : > { %v654_v60 = vpop.xlane.xlu0 %653 }
 0x297   : > { %v659_v61 = vrot.slane %v654_v60, %v1786_v26  ;;  %v663_v62 = vrot.slane %v654_v60, %v662_v57  ;;  %v667_v63 = vrot.slane %v654_v60, %v666_v58  ;;  %v671_v1 = vrot.slane %v654_v60, %v670_v59 }
 0x298   : > { %v675_v17 = vrot.slane %v654_v60, %v674_v0  ;;  %v679_v22 = vrot.slane %v654_v60, %v678_v15  ;;  %v683_v27 = vrot.slane %v654_v60, %v682_v21 }
 0x299   : > { %v696_v2 = vsub.f32 %v572_v34, %v659_v61  ;;  %v697_v3 = vsub.f32 %v575_v32, %v663_v62  ;;  %v698_v4 = vsub.f32 %v578_v38, %v667_v63  ;;  %v699_v19 = vsub.f32 %v581_v35, %v671_v1 }
 0x29a   : > { %v700_v23 = vsub.f32 %v584_v39, %v675_v17  ;;  %v701_v28 = vsub.f32 %v587_v45, %v679_v22  ;;  %v687_v32 = vrot.slane %v654_v60, %v686_v25  ;;  %v702_v34 = vsub.f32 %v590_v46, %v683_v27 }
 0x29b   : > { %v704_v6 = vmul.f32 1.442695, %v696_v2  ;;  %v706_v14 = vmul.f32 1.442695, %v697_v3  ;;  %v708_v20 = vmul.f32 1.442695, %v698_v4 }
 0x29c   : > { %v710_v24 = vmul.f32 1.442695, %v699_v19  ;;  %v712_v29 = vmul.f32 1.442695, %v700_v23  ;;  %v714_v35 = vmul.f32 1.442695, %v701_v28  ;;  %v703_v37 = vsub.f32 %v593_v51, %v687_v32 }
 0x29d   : > { %1312 = vpow2.f32 %v704_v6  ;;  %v716_v38 = vmul.f32 1.442695, %v702_v34 }
 0x29e   : > { %1314 = vpow2.f32 %v706_v14  ;;  %v718_v40 = vmul.f32 1.442695, %v703_v37 }
 0x29f   : > { %1316 = vpow2.f32 %v708_v20 }
 0x2a0   : > { %1318 = vpow2.f32 %v710_v24 }
 0x2a1   : > { %1320 = vpow2.f32 %v712_v29 }
 0x2a2   : > { %1322 = vpow2.f32 %v714_v35 }
 0x2a3   : > { %1324 = vpow2.f32 %v716_v38 }
 0x2a4   : > { %1326 = vpow2.f32 %v718_v40 }
 0x2a7   : > { %v1313_v30 = vpop.eup %1312 }
 0x2a8   : > { %v1315_v31 = vpop.eup %1314  ;;  %729 = vperm.xlu1 %1293, %v1313_v30  }
 0x2a9   : > { %732 = vperm.xlu0 %1294, %v1315_v31   ;;  %v1317_v36 = vpop.eup %1316 }
 0x2aa   : > { %v1319_v39 = vpop.eup %1318 }
 0x2ab   : > { %v1321_v41 = vpop.eup %1320 }
 0x2ac   : > { %735 = vperm.xlu1 %1293, %v1317_v36   ;;  %v1323_v16 = vpop.eup %1322 }
 0x2ad   : > { %v1325_v42 = vpop.eup %1324 }
 0x2ae   : > { %v1327_v43 = vpop.eup %1326 }
 0x2b0   : > { %738 = vperm.xlu1 %1293, %v1319_v39  }
 0x2b4   : > { %741 = vperm.xlu1 %1293, %v1321_v41  }
 0x2b8   : > { %744 = vperm.xlu1 %1293, %v1323_v16  }
 0x2bc   : > { %747 = vperm.xlu1 %1293, %v1325_v42  }
 0x2c0   : > { %750 = vperm.xlu1 %1293, %v1327_v43  }
 0x327   : > { %v730_v44 = vpop.permute.xlu1 %729 }
 0x328   : > { %v733_v48 = vpop.permute.xlu0 %732  ;;  %v755_v51 = vrot.slane %v730_v44, %v1809_v33 }
 0x329   : > { %v759_v50 = vrot.slane %v733_v48, %v1809_v33 }
 0x32b   : > { %v736_v45 = vpop.permute.xlu1 %735  ;;  %v784_v56 = vsel %vm636_vm1, %v759_v50, %v755_v51 }
 0x32c   : > { %v763_v52 = vrot.slane %v736_v45, %v1809_v33 }
 0x32e   : > { %v785_v61 = vsel %vm638_vm2, %v763_v52, %v784_v56 }
 0x32f   : > { %v739_v46 = vpop.permute.xlu1 %738 }
 0x330   : > { %v767_v53 = vrot.slane %v739_v46, %v1809_v33 }
 0x332   : > { %v786_v63 = vsel %vm640_vm3, %v767_v53, %v785_v61 }
 0x333   : > { %v742_v47 = vpop.permute.xlu1 %741 }
 0x334   : > { %v771_v54 = vrot.slane %v742_v47, %v1809_v33 }
 0x336   : > { %v787_v1 = vsel %vm642_vm4, %v771_v54, %v786_v63 }
 0x337   : > { %v745_v49 = vpop.permute.xlu1 %744 }
 0x338   : > { %v775_v60 = vrot.slane %v745_v49, %v1809_v33 }
 0x33a   : > { %v788_v3 = vsel %vm644_vm5, %v775_v60, %v787_v1 }
 0x33b   : > { %v748_v55 = vpop.permute.xlu1 %747 }
 0x33c   : > { %v779_v62 = vrot.slane %v748_v55, %v1809_v33 }
 0x33e   : > { %v789_v6 = vsel %vm646_vm6, %v779_v62, %v788_v3 }
 0x33f   : > { %v751_v2 = vpop.permute.xlu1 %750 }
 0x340   : > { %v783_v4 = vrot.slane %v751_v2, %v1809_v33 }
 0x342   : > { %v790_v14 = vsel %vm648_vm7, %v783_v4, %v789_v6 }
 0x343   : > { %v792_v17 = vsel %vm651_vm8, %v790_v14, 0.0 }
 0x344   : > { %793 = vadd.xlane.f32.xlu1 %v792_v17 }
 0x3d1   : > { %v794_v19 = vpop.xlane.xlu1 %793 }
 0x3d2   : > { %1328 = vrcp.f32 %v794_v19 }
 0x3dc   : > { %v1329_v20 = vpop.eup %1328 }
 0x3dd   : > { %v800_v22 = vrot.slane %v1329_v20, %v1786_v26  ;;  %v804_v24 = vrot.slane %v1329_v20, %v662_v57  ;;  %v808_v28 = vrot.slane %v1329_v20, %v666_v58  ;;  %v812_v32 = vrot.slane %v1329_v20, %v670_v59 }
 0x3de   : > { %v816_v35 = vrot.slane %v1329_v20, %v674_v0  ;;  %v820_v57 = vrot.slane %v1329_v20, %v678_v15  ;;  %v824_v58 = vrot.slane %v1329_v20, %v682_v21  ;;  %v828_v59 = vrot.slane %v1329_v20, %v686_v25 }
 0x3df   : > { %v837_v23 = vmul.f32 %v1313_v30, %v800_v22  ;;  %v838_v27 = vmul.f32 %v1315_v31, %v804_v24  ;;  %v839_v29 = vmul.f32 %v1317_v36, %v808_v28  ;;  %v840_v34 = vmul.f32 %v1319_v39, %v812_v32 }
 0x3e0   : > { %v841_v26 = vmul.f32 %v1321_v41, %v816_v35  ;;  %v842_v30 = vmul.f32 %v1323_v16, %v820_v57  ;;  %v843_v31 = vmul.f32 %v1325_v42, %v824_v58  ;;  %v844_v36 = vmul.f32 %v1327_v43, %v828_v59 }
 0x3e1   : > { %847 = vperm.xlu0 %1294, %v837_v23  }
 0x3e5   : > { %852 = vperm.xlu0 %1294, %v838_v27  }
 0x3e9   : > { %857 = vperm.xlu0 %1294, %v839_v29  }
 0x3ed   : > { %862 = vperm.xlu0 %1294, %v840_v34  }
 0x3f1   : > { %867 = vperm.xlu0 %1294, %v841_v26  }
 0x3f5   : > { %872 = vperm.xlu0 %1294, %v842_v30  }
 0x3f9   : > { %877 = vperm.xlu0 %1294, %v843_v31  }
 0x3fd   : > { %882 = vperm.xlu0 %1294, %v844_v36  }
 0x460   : > { %v848_v37 = vpop.permute.xlu0 %847 }
 0x461   : > { %v885_v39 = vmul.f32 %v848_v37, %v1741_v5  ;;  %v952_v54 = vrot.slane %v848_v37, %v1809_v33 }
 0x463   : > { %v893_v41 = vsel %vm318_vm0, %v885_v39, 0.0 }
 0x464   : > { %v853_v0 = vpop.permute.xlu0 %852  ;;  %v894_v43 = vrot.slane %v893_v41, 4 }
 0x465   : > { %v886_v38 = vmul.f32 %v853_v0, %v1751_v8 }
 0x466   : > { %v895_v47 = vadd.f32 %v894_v43, %v893_v41 }
 0x467   : > { %v900_v21 = vsel %vm318_vm0, %v886_v38, 0.0 }
 0x468   : > { %v858_v15 = vpop.permute.xlu0 %857  ;;  %v901_v42 = vrot.slane %v900_v21, 4 }
 0x469   : > { %v887_v40 = vmul.f32 %v858_v15, %v1757_v10  ;;  %v960_v56 = vrot.slane %v858_v15, %v1809_v33 }
 0x46a   : > { %v902_v10 = vadd.f32 %v901_v42, %v900_v21 }
 0x46b   : > { %v907_v18 = vsel %vm318_vm0, %v887_v40, 0.0 }
 0x46c   : > { %v863_v25 = vpop.permute.xlu0 %862  ;;  %v908_v44 = vrot.slane %v907_v18, 4  ;;  %v903_v55 = vrot.slane %v902_v10, 2 }
 0x46d   : > { %v888_v16 = vmul.f32 %v863_v25, %v1769_v12  ;;  %v956_v12 = vrot.slane %v853_v0, %v1809_v33  ;;  %v964_v62 = vrot.slane %v863_v25, %v1809_v33 }
 0x46e   : > { %v909_v48 = vadd.f32 %v908_v44, %v907_v18  ;;  %v904_v19 = vadd.f32 %v903_v55, %v902_v10 }
 0x46f   : > { %v914_v8 = vsel %vm318_vm0, %v888_v16, 0.0  ;;  %v981_v4 = vsel %vm636_vm1, %v956_v12, %v952_v54 }
 0x470   : > { %v915_v45 = vrot.slane %v914_v8, 4  ;;  %v868_v5 = vpop.permute.xlu0 %867  ;;  %v910_v61 = vrot.slane %v909_v48, 2  ;;  %v982_v20 = vsel %vm638_vm2, %v960_v56, %v981_v4  ;;  %v905_v59 = vrot.slane %v904_v19, 1 }
 0x471   : > { %v889_v46 = vmul.f32 %v868_v5, %v1746_v7  ;;  %v896_v7 = vrot.slane %v895_v47, 2  ;;  %v968_v2 = vrot.slane %v868_v5, %v1809_v33  ;;  %v983_v28 = vsel %vm640_vm3, %v964_v62, %v982_v20 }
 0x472   : > { %v916_v50 = vadd.f32 %v915_v45, %v914_v8  ;;  %v911_v27 = vadd.f32 %v910_v61, %v909_v48 }
 0x473   : > { %v921_v49 = vsel %vm318_vm0, %v889_v46, 0.0  ;;  %v897_v24 = vadd.f32 %v896_v7, %v895_v47  ;;  %v984_v34 = vsel %vm642_vm4, %v968_v2, %v983_v28 }
 0x474   : > { %v922_v51 = vrot.slane %v921_v49, 4  ;;  %v873_v52 = vpop.permute.xlu0 %872  ;;  %v917_v1 = vrot.slane %v916_v50, 2  ;;  %v912_v38 = vrot.slane %v911_v27, 1 }
 0x475   : > { %v890_v53 = vmul.f32 %v873_v52, %v1754_v9  ;;  %v972_v14 = vrot.slane %v873_v52, %v1809_v33  ;;  %v898_v40 = vrot.slane %v897_v24, 1 }
 0x476   : > { %v923_v60 = vadd.f32 %v922_v51, %v921_v49  ;;  %v918_v32 = vadd.f32 %v917_v1, %v916_v50  ;;  %v913_v43 = vadd.f32 %v912_v38, %v911_v27 }
 0x477   : > { %v928_v63 = vsel %vm318_vm0, %v890_v53, 0.0  ;;  %v985_v30 = vsel %vm644_vm5, %v972_v14, %v984_v34  ;;  %v899_v44 = vadd.f32 %v898_v40, %v897_v24 }
 0x478   : > { %v929_v3 = vrot.slane %v928_v63, 4  ;;  %v878_v9 = vpop.permute.xlu0 %877  ;;  %v924_v6 = vrot.slane %v923_v60, 2  ;;  %v919_v21 = vrot.slane %v918_v32, 1 }
 0x479   : > { %v891_v17 = vmul.f32 %v878_v9, %v1760_v11  ;;  %v976_v23 = vrot.slane %v878_v9, %v1809_v33 }
 0x47a   : > { %v930_v22 = vadd.f32 %v929_v3, %v928_v63  ;;  %v925_v11 = vadd.f32 %v924_v6, %v923_v60  ;;  %v920_v8 = vadd.f32 %v919_v21, %v918_v32 }
 0x47b   : > { %v935_v29 = vsel %vm318_vm0, %v891_v17, 0.0  ;;  %v986_v0 = vsel %vm646_vm6, %v976_v23, %v985_v30 }
 0x47c   : > { %v931_v35 = vrot.slane %v930_v22, 2  ;;  %v936_v26 = vrot.slane %v935_v29, 4  ;;  %v883_v57 = vpop.permute.xlu0 %882  ;;  %v926_v25 = vrot.slane %v925_v11, 1 }
 0x47d   : > { %v892_v58 = vmul.f32 %v883_v57, %v1774_v13  ;;  %v980_v31 = vrot.slane %v883_v57, %v1809_v33  ;;  %v906_v13 = vadd.f32 %v905_v59, %v904_v19 }
 0x47e   : > { %v932_v36 = vadd.f32 %v931_v35, %v930_v22  ;;  %v937_v37 = vadd.f32 %v936_v26, %v935_v29  ;;  %v927_v46 = vadd.f32 %v926_v25, %v925_v11 }
 0x47f   : > { %v942_v39 = vsel %vm318_vm0, %v892_v58, 0.0  ;;  %v987_v15 = vsel %vm648_vm7, %v980_v31, %v986_v0  ;;  %v998_v10 = vsel %vm636_vm1, %v906_v13, %v899_v44 }
 0x480   : > { %v938_v41 = vrot.slane %v937_v37, 2  ;;  %v943_v18 = vrot.slane %v942_v39, 4  ;;  %989 = vst.msk [vmem:[%s305_s16] sm:$0xff] %vm651_vm8, %v987_v15  ;;  %v933_v16 = vrot.slane %v932_v36, 1  ;;  %v999_v49 = vsel %vm638_vm2, %v913_v43, %v998_v10 }
 0x481   : > { %v1000_v51 = vsel %vm640_vm3, %v920_v8, %v999_v49 }
 0x482   : > { %v939_v33 = vadd.f32 %v938_v41, %v937_v37  ;;  %v944_v42 = vadd.f32 %v943_v18, %v942_v39  ;;  %v934_v47 = vadd.f32 %v933_v16, %v932_v36  ;;  %v1001_v12 = vsel %vm642_vm4, %v927_v46, %v1000_v51 }
 0x484   : > { %v940_v45 = vrot.slane %v939_v33, 1  ;;  %v945_v5 = vrot.slane %v944_v42, 2  ;;  %v1002_v53 = vsel %vm644_vm5, %v934_v47, %v1001_v12 }
 0x486   : > { %v946_v48 = vadd.f32 %v945_v5, %v944_v42  ;;  %v941_v50 = vadd.f32 %v940_v45, %v939_v33 }
 0x488   : > { %v947_v52 = vrot.slane %v946_v48, 1  ;;  %v1003_v55 = vsel %vm646_vm6, %v941_v50, %v1002_v53 }
 0x48a   : > { %v948_v54 = vadd.f32 %v947_v52, %v946_v48 }
 0x48c   : > { %v1004_v56 = vsel %vm648_vm7, %v948_v54, %v1003_v55 }
 0x48d   : > { %1006 = vst.msk [vmem:[%s294_s11] sm:$0xff] %vm318_vm0, %v1004_v56 }
 0x48e   : > { %1431 = shalt.err (!%p1428_p8)
}
 0x48f   : > { %s1432_s29 = scalar_lea.hbm %s1932_s17, 128  ;;  %s1436_s27 = scalar_lea.hbm %s1982_s4, 256 }
 0x490   : > { %p1433_p10 = scmp.ne.s32.totalorder %s1932_s17, %s1432_s29  ;;  %p1437_p11 = scmp.lt.u32.totalorder %s1932_s17, %s1982_s4 }
 0x491   : > { %p1438_p13 = scmp.lt.u32.totalorder %s1436_s27, %s1432_s29  ;;  %p1440_p7 = scmp.lt.u32.totalorder %s1432_s29, %s1932_s17 }
 0x492   : > { %p1434_p0 = pnand %p1433_p10, %p1626_p12 }
 0x493   : > { %p1439_p3 = por %p1438_p13, %p1437_p11 }
 0x494   : > { %p1435_p4 = pneg %p1434_p0 }
 0x495   : > { %p1441_p9 = por %p1440_p7, %p1439_p3 }
 0x497   : > { %p1442_p1 = pnand %p1441_p9, %p1435_p4 }
 0x499   : > { %1445 = shalt.err (!%p1442_p1)
}
 0x49a   : > { %1235 = dma.vmem_to_hbm [thread:$0]  (%p1626_p12), %s1934_s13, 128, %s1932_s17, %s1008_s22  }
 0x49b PF: > { %s1040_s16 = sand.u32 1, %s1480_s18   ;;  %p2004_p5 = scmp.ne.s32.totalorder %s1991_s25, 0 }
 0x49c   : > { %p2005_p2 = scmp.ge.s32.totalorder %s1492_s21, 2  ;;  %s1041_s0 = scalar_lea.sflag [#allocation4], %s1040_s16 }
 0x49e   : > { %p1249_p6 = pnand %p2005_p2, %p2004_p5 }
 0x4a0   : > { %1475 = dma.done.wait (!%p1249_p6), %s1041_s0, 128  }
 0x4a1   : > { %1477 = vsyncadd (!%p1249_p6), %s1041_s0, 4294967168  ;;  %p22_p8 = scmp.ge.s32.totalorder %s1588_s30, 4   ;;  %s2006_s18 = smov %s1484_s19 }
 0x4a2   : > { %s2007_s19 = smov %s1488_s20  ;;  %s2008_s20 = smov %s1622_s8 }
 0x4a3   : > { %s2009_s21 = smov %s1588_s30  ;;  %24 = sbr.rel (!%p22_p8) target bundleno = 9 (0x9), region = 110 }
 0x4aa   :  { %1053 = vsyncpa [#allocation3], 1 }
 0x4ab   :  { %1055 = vsyncpa [#allocation3 + $0x1], 1 }
 0x4ac   :  { %1056 = vsyncpa [#allocation6], 1 }
 0x4ad   :  { %1058 = vsyncpa [#allocation6 + $0x1], 1 }
 0x4ae   :  { %1059 = vsyncpa [#allocation4], 1 }
 0x4af   :  { %1061 = vsyncpa [#allocation4 + $0x1], 1 }

</bundles_post_ra>
